<compile_context>
chip_gen: v5e
topology: v5e:2x2
jax: 0.10.0
libtpu: 0.0.40
codegen_flags: <defaults>
</compile_context>

<pallas_src>
import functools
import math

import jax
import jax.numpy as jnp
from jax.experimental import pallas as pl
from jax.experimental.pallas import tpu as pltpu


def _round_up(x, m):
    return (x + m - 1) // m * m


def _plan_tile(n, block, granule):
    """Even-split tile for `n` under requested `block`, rounded to `granule`."""
    block = max(granule, _round_up(min(block, max(n, 1)), granule))
    n_tiles = -(-n // block)                       # number of tiles
    tile = _round_up(-(-n // n_tiles), granule)    # even split, granule-rounded
    return tile, n_tiles, n_tiles * tile


def _plan(n_nodes, in_dim, out_dim, block_rows, block_k):
    tm, m_tiles, n_rows = _plan_tile(n_nodes, block_rows, 8)    # sublane granule
    tk, k_tiles, n_k = _plan_tile(n_nodes, block_k, 128)        # lane granule
    id_pad = _round_up(in_dim, 128)
    out_pad = _round_up(out_dim, 128)
    return tm, m_tiles, n_rows, tk, k_tiles, n_k, id_pad, out_pad


def _pad_cast(arr, shape, dtype):
    """Zero-pad + cast, skipping the HBM copy when nothing actually changes."""
    if arr.shape == shape and arr.dtype == dtype:
        return arr
    if arr.shape == shape:
        return arr.astype(dtype)
    out = jnp.zeros(shape, dtype)
    return out.at[tuple(slice(0, s) for s in arr.shape)].set(arr.astype(dtype))


def pad_adjacency(A, n_nodes, *, block_rows=1024, block_k=2048,
                  stream_dtype=jnp.float32):
    """Pre-pad/cast the adjacency ONCE (it is constant across layers / steps).

    Must use the same block_rows / block_k / stream_dtype as the forward call.
    """
    _, _, n_rows, _, _, n_k, _, _ = _plan(n_nodes, 1, 1, block_rows, block_k)
    return _pad_cast(A, (n_rows, n_k), stream_dtype)


def _vmem_limit(est_bytes):
    # 1.5x the block-level estimate (covers double-buffering slack + internal
    # scratch), floored at 16 MiB (always safe), capped well under v7x's 64 MiB.
    return min(max(int(1.5 * est_bytes) + (1 << 20), 16 * 2**20), 48 * 2**20)


# ----------------------------- kernels --------------------------------------

def _xw_kernel(x_ref, w_ref, o_ref):
    # XW tile = X_tile @ W (W resident). f32 MXU accumulate, store in stream dtype.
    o_ref[...] = jnp.dot(
        x_ref[...], w_ref[...], preferred_element_type=jnp.float32
    ).astype(o_ref.dtype)


def _axw_bias_kernel(a_ref, xw_ref, b_ref, o_ref):
    # grid = (row_tiles, k_tiles).  o_ref's block index is constant across k, so
    # the f32 output block stays VMEM-resident for the whole reduction and
    # doubles as the accumulator (no separate scratch buffer).
    k = pl.program_id(1)

    @pl.when(k == 0)
    def _init():
        o_ref[...] = jnp.zeros_like(o_ref)

    o_ref[...] += jnp.dot(a_ref[...], xw_ref[...],
                          preferred_element_type=jnp.float32)

    @pl.when(k == pl.num_programs(1) - 1)
    def _finalize():
        # Bias folded into the single finalize (lane-dense, 128-padded output).
        o_ref[...] += b_ref[...]


def _fused_kernel(a_ref, x_ref, w_ref, b_ref, o_ref):
    # Whole problem fits one tile: out = A @ (X @ W) + b in one launch.
    xw = jnp.dot(x_ref[...], w_ref[...],
                 preferred_element_type=jnp.float32).astype(a_ref.dtype)
    o_ref[...] = jnp.dot(a_ref[...], xw,
                         preferred_element_type=jnp.float32) + b_ref[...]


# ----------------------------- forward --------------------------------------

@functools.partial(
    jax.jit, static_argnames=("block_rows", "block_k", "stream_dtype"))
def gcn_layer_forward(A, X, W, bias=None, *,
                      block_rows=1024, block_k=2048,
                      stream_dtype=jnp.float32):
    """out = A @ (X @ W) + bias   (matches PyTorch GCN_Layer.forward).

    A may be the raw (N, N) adjacency or the output of pad_adjacency() (in the
    latter case no per-call pad/cast of A happens at all).
    """
    N, in_dim = X.shape
    out_dim = W.shape[1]
    f32 = jnp.float32
    itm = jnp.dtype(stream_dtype).itemsize

    tm, m_tiles, n_rows, tk, k_tiles, n_k, id_pad, out_pad = _plan(
        N, in_dim, out_dim, block_rows, block_k)

    # Pad/cast only when needed (no-op for pre-padded A or already-aligned shapes).
    A_p = _pad_cast(A, (n_rows, n_k), stream_dtype)
    X_p = _pad_cast(X, (n_k, id_pad), stream_dtype)
    W_p = _pad_cast(W, (id_pad, out_pad), stream_dtype)
    if bias is None:
        b_p = jnp.zeros((1, out_pad), f32)
    else:
        b_p = _pad_cast(bias.astype(f32).reshape(1, out_dim), (1, out_pad), f32)

    # ---- Small-problem fast path: everything fits one tile -> fused kernel ----
    if m_tiles == 1 and k_tiles == 1:
        est = ((n_rows * n_k + n_k * id_pad + id_pad * out_pad) * itm
               + (n_rows + 1) * out_pad * 4)
        out_p = pl.pallas_call(
            _fused_kernel,
            out_shape=jax.ShapeDtypeStruct((n_rows, out_pad), f32),
            grid_spec=pltpu.PrefetchScalarGridSpec(
                num_scalar_prefetch=0,
                grid=(1,),
                in_specs=[
                    pl.BlockSpec((n_rows, n_k), lambda i: (0, 0)),
                    pl.BlockSpec((n_k, id_pad), lambda i: (0, 0)),
                    pl.BlockSpec((id_pad, out_pad), lambda i: (0, 0)),
                    pl.BlockSpec((1, out_pad), lambda i: (0, 0)),
                ],
                out_specs=pl.BlockSpec((n_rows, out_pad), lambda i: (0, 0)),
            ),
            compiler_params=pltpu.CompilerParams(
                vmem_limit_bytes=_vmem_limit(2 * est)),
            cost_estimate=pl.CostEstimate(
                flops=2 * n_k * id_pad * out_pad + 2 * n_rows * n_k * out_pad,
                transcendentals=0,
                bytes_accessed=est),
        )(A_p, X_p, W_p, b_p)
        return out_p[:N, :out_dim]

    # ---- Kernel 1: XW = X @ W (computed once, not per A row-tile) ----
    est1 = 2 * (tk * id_pad + id_pad * out_pad + tk * out_pad) * itm
    xw = pl.pallas_call(
        _xw_kernel,
        out_shape=jax.ShapeDtypeStruct((n_k, out_pad), stream_dtype),
        grid_spec=pltpu.PrefetchScalarGridSpec(
            num_scalar_prefetch=0,
            grid=(k_tiles,),
            in_specs=[
                pl.BlockSpec((tk, id_pad), lambda i: (i, 0)),
                pl.BlockSpec((id_pad, out_pad), lambda i: (0, 0)),   # W resident
            ],
            out_specs=pl.BlockSpec((tk, out_pad), lambda i: (i, 0)),
        ),
        compiler_params=pltpu.CompilerParams(
            dimension_semantics=("parallel",),
            vmem_limit_bytes=_vmem_limit(est1)),
        cost_estimate=pl.CostEstimate(
            flops=2 * n_k * id_pad * out_pad,
            transcendentals=0,
            bytes_accessed=(n_k * id_pad + id_pad * out_pad + n_k * out_pad) * itm),
    )(X_p, W_p)

    # ---- Kernel 2: out = A @ XW + bias  (A streamed, XW blocked along k) ----
    # XW per-k blocking bounds VMEM for any N (no fully-resident XW block);
    # extra XW HBM traffic is only ~out_pad/tm of the A stream.
    est2 = (2 * (tm * tk + tk * out_pad) * itm
            + 2 * tm * out_pad * 4 + 2 * out_pad * 4)
    out_p = pl.pallas_call(
        _axw_bias_kernel,
        out_shape=jax.ShapeDtypeStruct((n_rows, out_pad), f32),
        grid_spec=pltpu.PrefetchScalarGridSpec(
            num_scalar_prefetch=0,
            grid=(m_tiles, k_tiles),
            in_specs=[
                pl.BlockSpec((tm, tk), lambda i, k: (i, k)),        # A: streamed
                pl.BlockSpec((tk, out_pad), lambda i, k: (k, 0)),   # XW: k-blocked
                pl.BlockSpec((1, out_pad), lambda i, k: (0, 0)),    # bias: resident
            ],
            out_specs=pl.BlockSpec((tm, out_pad), lambda i, k: (i, 0)),
        ),
        compiler_params=pltpu.CompilerParams(
            dimension_semantics=("parallel", "arbitrary"),
            vmem_limit_bytes=_vmem_limit(est2)),
        cost_estimate=pl.CostEstimate(
            flops=2 * n_rows * n_k * out_pad,
            transcendentals=0,
            bytes_accessed=n_rows * n_k * itm
            + m_tiles * n_k * out_pad * itm
            + out_pad * 4
            + n_rows * out_pad * 4),
    )(A_p, xw, b_p)

    return out_p[:N, :out_dim]


def init_gcn_params(key, in_dim, out_dim, bias=True):
    """Matches PyTorch reset_parameters(): U(-stdv, stdv), stdv = 1/sqrt(out_dim)."""
    stdv = 1.0 / math.sqrt(out_dim)
    kw, kb = jax.random.split(key)
    W = jax.random.uniform(kw, (in_dim, out_dim), jnp.float32, -stdv, stdv)
    b = (jax.random.uniform(kb, (out_dim,), jnp.float32, -stdv, stdv)
         if bias else None)
    return W, b


if __name__ == "__main__":
    # --- Test 1: small graph consistent with the module (fused single-tile path) ---
    N, in_dim, out_dim = 16, 32, 2
    k_a, k_x, k_p = jax.random.split(jax.random.PRNGKey(0), 3)

    # Symmetric, row-normalized adjacency with self-loops (typical GCN input).
    A_raw = (jax.random.uniform(k_a, (N, N)) > 0.7).astype(jnp.float32)
    A_sym = jnp.maximum(A_raw, A_raw.T) + jnp.eye(N, dtype=jnp.float32)
    A = A_sym / jnp.sum(A_sym, axis=1, keepdims=True)
    X = jax.random.normal(k_x, (N, in_dim), jnp.float32)
    W, b = init_gcn_params(k_p, in_dim, out_dim, bias=True)

    ref = A @ (X @ W) + b
    out = jax.block_until_ready(gcn_layer_forward(A, X, W, b))
    assert out.shape == (N, out_dim)
    assert jnp.allclose(out, ref, atol=1e-5, rtol=1e-5)

    # Same call but with the adjacency pad/cast hoisted out of the per-call path.
    A_pre = pad_adjacency(A, N)
    out_pre = jax.block_until_ready(gcn_layer_forward(A_pre, X, W, b))
    assert jnp.allclose(out_pre, ref, atol=1e-5, rtol=1e-5)

    # --- Test 2: multi-tile streamed path (kernel 1 + kernel 2, k reduction) ---
    N2, in2, out2 = 320, 64, 2
    k_a2, k_x2, k_p2 = jax.random.split(jax.random.PRNGKey(1), 3)
    A2_raw = (jax.random.uniform(k_a2, (N2, N2)) > 0.9).astype(jnp.float32)
    A2_sym = jnp.maximum(A2_raw, A2_raw.T) + jnp.eye(N2, dtype=jnp.float32)
    A2 = A2_sym / jnp.sum(A2_sym, axis=1, keepdims=True)
    X2 = jax.random.normal(k_x2, (N2, in2), jnp.float32)
    W2, b2 = init_gcn_params(k_p2, in2, out2, bias=True)
    ref2 = A2 @ (X2 @ W2) + b2

    # Force small tiles so the (row, k) grid and in-place output accumulation run.
    out2_f32 = jax.block_until_ready(
        gcn_layer_forward(A2, X2, W2, b2, block_rows=128, block_k=128))
    assert out2_f32.shape == (N2, out2)
    assert jnp.allclose(out2_f32, ref2, atol=1e-4, rtol=1e-4)

    # bf16 streaming fast path (halves A-stream HBM traffic; f32 accumulation).
    out2_bf16 = jax.block_until_ready(
        gcn_layer_forward(A2, X2, W2, b2, block_rows=128, block_k=128,
                          stream_dtype=jnp.bfloat16))
    assert jnp.allclose(out2_bf16, ref2, atol=5e-2, rtol=5e-2)

    # TODO(synk): torch.autograd.set_detect_anomaly(True) is a training-time
    # debug hook with no forward-pass effect; intentionally not translated.
    # TODO(synk): optional fp8 A-streaming on v7x (int8+scales on v6e) not
    # implemented; bf16 streaming is the provided reduced-precision fast path.

    print("KERNEL_OK")
</pallas_src>

<mosaic_0001>
module attributes {stable_mosaic.version = 11 : i64} {
  func.func @_fused_kernel(%arg0: i32, %arg1: memref<16x128xf32, #tpu.memory_space<vmem>>, %arg2: memref<128x128xf32, #tpu.memory_space<vmem>>, %arg3: memref<128x128xf32, #tpu.memory_space<vmem>>, %arg4: memref<1x128xf32, #tpu.memory_space<vmem>>, %arg5: memref<16x128xf32, #tpu.memory_space<vmem>>) attributes {dimension_semantics = [#tpu.dimension_semantics<arbitrary>], iteration_bounds = array<i64: 1>, scalar_prefetch = 0 : i64, scratch_operands = 0 : i64, tpu.core_type = #tpu.core_type<tc>, window_params = [{pipeline_mode = #tpu.pipeline_mode<synchronous>, transform_indices = @transform_0, window_bounds = array<i64: 16, 128>}, {pipeline_mode = #tpu.pipeline_mode<synchronous>, transform_indices = @transform_1, window_bounds = array<i64: 128, 128>}, {pipeline_mode = #tpu.pipeline_mode<synchronous>, transform_indices = @transform_2, window_bounds = array<i64: 128, 128>}, {pipeline_mode = #tpu.pipeline_mode<synchronous>, transform_indices = @transform_3, window_bounds = array<i64: 1, 128>}, {pipeline_mode = #tpu.pipeline_mode<synchronous>, transform_indices = @transform_4, window_bounds = array<i64: 16, 128>}]} {
    %c0 = arith.constant 0 : index
    %c0_0 = arith.constant 0 : index
    %0 = vector.load %arg2[%c0, %c0_0] : memref<128x128xf32, #tpu.memory_space<vmem>>, vector<128x128xf32>
    %c0_1 = arith.constant 0 : index
    %c0_2 = arith.constant 0 : index
    %1 = vector.load %arg3[%c0_1, %c0_2] : memref<128x128xf32, #tpu.memory_space<vmem>>, vector<128x128xf32>
    %cst = arith.constant dense<0.000000e+00> : vector<128x128xf32>
    %2 = tpu.matmul %0, %1, %cst {dimension_numbers = #tpu.dot_dimension_numbers<[1], [0], [0], [1], [0, 0, 1, 1], [], []>} : vector<128x128xf32>, vector<128x128xf32>, vector<128x128xf32> -> vector<128x128xf32>
    %c0_3 = arith.constant 0 : index
    %c0_4 = arith.constant 0 : index
    %3 = vector.load %arg1[%c0_3, %c0_4] : memref<16x128xf32, #tpu.memory_space<vmem>>, vector<16x128xf32>
    %cst_5 = arith.constant dense<0.000000e+00> : vector<16x128xf32>
    %4 = tpu.matmul %3, %2, %cst_5 {dimension_numbers = #tpu.dot_dimension_numbers<[1], [0], [0], [1], [0, 0, 1, 1], [], []>} : vector<16x128xf32>, vector<128x128xf32>, vector<16x128xf32> -> vector<16x128xf32>
    %c0_6 = arith.constant 0 : index
    %c0_7 = arith.constant 0 : index
    %5 = vector.load %arg4[%c0_6, %c0_7] : memref<1x128xf32, #tpu.memory_space<vmem>>, vector<1x128xf32>
    %6 = vector.broadcast %5 : vector<1x128xf32> to vector<16x128xf32>
    %7 = arith.addf %4, %6 : vector<16x128xf32>
    %c0_8 = arith.constant 0 : index
    %c0_9 = arith.constant 0 : index
    %8 = vector.load %arg5[%c0_8, %c0_9] : memref<16x128xf32, #tpu.memory_space<vmem>>, vector<16x128xf32>
    tpu.vector_store %arg5[%c0_8, %c0_9], %7 {strides = array<i32>} : memref<16x128xf32, #tpu.memory_space<vmem>>, vector<16x128xf32>,
    return
  }
  func.func @transform_0(%arg0: i32) -> (i32, i32) {
    %c0_i32 = arith.constant 0 : i32
    %c0_i32_0 = arith.constant 0 : i32
    %c0_i32_1 = arith.constant 0 : i32
    return %c0_i32, %c0_i32_0 : i32, i32
  }
  func.func @transform_1(%arg0: i32) -> (i32, i32) {
    %c0_i32 = arith.constant 0 : i32
    %c0_i32_0 = arith.constant 0 : i32
    %c0_i32_1 = arith.constant 0 : i32
    return %c0_i32, %c0_i32_0 : i32, i32
  }
  func.func @transform_2(%arg0: i32) -> (i32, i32) {
    %c0_i32 = arith.constant 0 : i32
    %c0_i32_0 = arith.constant 0 : i32
    %c0_i32_1 = arith.constant 0 : i32
    return %c0_i32, %c0_i32_0 : i32, i32
  }
  func.func @transform_3(%arg0: i32) -> (i32, i32) {
    %c0_i32 = arith.constant 0 : i32
    %c0_i32_0 = arith.constant 0 : i32
    %c0_i32_1 = arith.constant 0 : i32
    return %c0_i32, %c0_i32_0 : i32, i32
  }
  func.func @transform_4(%arg0: i32) -> (i32, i32) {
    %c0_i32 = arith.constant 0 : i32
    %c0_i32_0 = arith.constant 0 : i32
    %c0_i32_1 = arith.constant 0 : i32
    return %c0_i32, %c0_i32_0 : i32, i32
  }
}

</mosaic_0001>

<bundles_post_ra>
// kernel: gcn_layer_forward.1
= control target key start
LH: loop header
LB: loop body
LE: loop exit
PB: predicated region body
PF: predicated region fallthrough
CT: control target
= control target key end

     0   :  { %s318_s2 = inlined_call_operand.vmem [shape: f32[128,128], index: 2, kind: input, shape index: {}]   ;;  %s319_s1 = inlined_call_operand.vmem [shape: f32[128,128], index: 1, kind: input, shape index: {}]   ;;  %s320_s3 = inlined_call_operand.vmem [shape: f32[1,128], index: 3, kind: input, shape index: {}]   ;;  %s321_s0 = inlined_call_operand.vmem [shape: f32[16,128], index: 0, kind: input, shape index: {}]   ;;  %s322_s4 = inlined_call_operand.vmem [shape: f32[16,128], index: 4, kind: output, shape index: {}]  }
   0x1   :  { %v48_v0 = vld [vmem:[%s318_s2 + $0x78] sm:$0xff]  ;;  %v47_v1 = vld [vmem:[%s318_s2 + $0x70] sm:$0xff]  ;;  %v46_v2 = vld [vmem:[%s318_s2 + $0x68] sm:$0xff] }
   0x2   :  { %150 = vmatpush.msra.mxu3 %v48_v0  ;;  %149 = vmatpush.msra.mxu2 %v48_v0  ;;  %v45_v3 = vld [vmem:[%s318_s2 + $0x60] sm:$0xff]  ;;  %v44_v4 = vld [vmem:[%s318_s2 + $0x58] sm:$0xff]  ;;  %v43_v5 = vld [vmem:[%s318_s2 + $0x50] sm:$0xff] }
   0x3   :  { %49 = vmatpush.msra.mxu0 %v48_v0  ;;  %v42_v6 = vld [vmem:[%s318_s2 + $0x48] sm:$0xff]  ;;  %v41_v7 = vld [vmem:[%s318_s2 + $0x40] sm:$0xff]  ;;  %v40_v8 = vld [vmem:[%s318_s2 + $0x38] sm:$0xff] }
   0x4   :  { %152 = vmatpush.msra.mxu3 %v47_v1  ;;  %151 = vmatpush.msra.mxu2 %v47_v1  ;;  %v39_v9 = vld [vmem:[%s318_s2 + $0x30] sm:$0xff]  ;;  %v38_v10 = vld [vmem:[%s318_s2 + $0x28] sm:$0xff]  ;;  %v37_v11 = vld [vmem:[%s318_s2 + $0x20] sm:$0xff] }
   0x5   :  { %50 = vmatpush.msra.mxu0 %v47_v1  ;;  %v36_v12 = vld [vmem:[%s318_s2 + $0x18] sm:$0xff]  ;;  %v35_v13 = vld [vmem:[%s318_s2 + $0x10] sm:$0xff]  ;;  %v34_v14 = vld [vmem:[%s318_s2 + $0x8] sm:$0xff] }
   0x6   :  { %154 = vmatpush.msra.mxu3 %v46_v2  ;;  %153 = vmatpush.msra.mxu2 %v46_v2  ;;  %v33_v15 = vld [vmem:[%s318_s2] sm:$0xff]  ;;  %v26_v16 = vld [vmem:[%s319_s1 + $0x48] sm:$0xff]  ;;  %v27_v18 = vld [vmem:[%s319_s1 + $0x50] sm:$0xff] }
   0x7   :  { %51 = vmatpush.msra.mxu0 %v46_v2  ;;  %v21_v17 = vld [vmem:[%s319_s1 + $0x20] sm:$0xff]  ;;  %v22_v19 = vld [vmem:[%s319_s1 + $0x28] sm:$0xff]  ;;  %v28_v20 = vld [vmem:[%s319_s1 + $0x58] sm:$0xff] }
   0x8   :  { %156 = vmatpush.msra.mxu3 %v45_v3  ;;  %155 = vmatpush.msra.mxu2 %v45_v3  ;;  %v23_v21 = vld [vmem:[%s319_s1 + $0x30] sm:$0xff]  ;;  %v17_v22 = vld [vmem:[%s319_s1] sm:$0xff]  ;;  %v24_v24 = vld [vmem:[%s319_s1 + $0x38] sm:$0xff] }
   0x9   :  { %52 = vmatpush.msra.mxu0 %v45_v3  ;;  %v29_v23 = vld [vmem:[%s319_s1 + $0x60] sm:$0xff]  ;;  %v18_v25 = vld [vmem:[%s319_s1 + $0x8] sm:$0xff]  ;;  %v19_v28 = vld [vmem:[%s319_s1 + $0x10] sm:$0xff] }
   0xa   :  { %158 = vmatpush.msra.mxu3 %v44_v4  ;;  %157 = vmatpush.msra.mxu2 %v44_v4  ;;  %v30_v26 = vld [vmem:[%s319_s1 + $0x68] sm:$0xff]  ;;  %v25_v27 = vld [vmem:[%s319_s1 + $0x40] sm:$0xff]  ;;  %v31_v29 = vld [vmem:[%s319_s1 + $0x70] sm:$0xff] }
   0xb   :  { %53 = vmatpush.msra.mxu0 %v44_v4  ;;  %v20_v30 = vld [vmem:[%s319_s1 + $0x18] sm:$0xff]  ;;  %v114_v48 = vld [vmem:[%s321_s0] sm:$0xff]  ;;  %v115_v49 = vld [vmem:[%s321_s0 + $0x8] sm:$0xff] }
   0xc   :  { %160 = vmatpush.msra.mxu3 %v43_v5  ;;  %159 = vmatpush.msra.mxu2 %v43_v5  ;;  %v32_v31 = vld [vmem:[%s319_s1 + $0x78] sm:$0xff]  ;;  %v181_v50 = vld [vmem:[%s320_s3] ss:$0 sm:$0xff] }
   0xd   :  { %54 = vmatpush.msra.mxu0 %v43_v5 }
   0xe   :  { %162 = vmatpush.msra.mxu3 %v42_v6  ;;  %161 = vmatpush.msra.mxu2 %v42_v6 }
   0xf   :  { %55 = vmatpush.msra.mxu0 %v42_v6 }
  0x10   :  { %164 = vmatpush.msra.mxu3 %v41_v7  ;;  %163 = vmatpush.msra.mxu2 %v41_v7 }
  0x11   :  { %56 = vmatpush.msra.mxu0 %v41_v7 }
  0x12   :  { %166 = vmatpush.msra.mxu3 %v40_v8  ;;  %165 = vmatpush.msra.mxu2 %v40_v8 }
  0x13   :  { %57 = vmatpush.msra.mxu0 %v40_v8 }
  0x14   :  { %168 = vmatpush.msra.mxu3 %v39_v9  ;;  %167 = vmatpush.msra.mxu2 %v39_v9 }
  0x15   :  { %58 = vmatpush.msra.mxu0 %v39_v9 }
  0x16   :  { %170 = vmatpush.msra.mxu3 %v38_v10  ;;  %169 = vmatpush.msra.mxu2 %v38_v10 }
  0x17   :  { %59 = vmatpush.msra.mxu0 %v38_v10 }
  0x18   :  { %172 = vmatpush.msra.mxu3 %v37_v11  ;;  %171 = vmatpush.msra.mxu2 %v37_v11 }
  0x19   :  { %60 = vmatpush.msra.mxu0 %v37_v11 }
  0x1a   :  { %174 = vmatpush.msra.mxu3 %v36_v12  ;;  %173 = vmatpush.msra.mxu2 %v36_v12 }
  0x1b   :  { %61 = vmatpush.msra.mxu0 %v36_v12 }
  0x1c   :  { %176 = vmatpush.msra.mxu3 %v35_v13  ;;  %175 = vmatpush.msra.mxu2 %v35_v13 }
  0x1d   :  { %62 = vmatpush.msra.mxu0 %v35_v13 }
  0x1e   :  { %178 = vmatpush.msra.mxu3 %v34_v14  ;;  %177 = vmatpush.msra.mxu2 %v34_v14 }
  0x1f   :  { %63 = vmatpush.msra.mxu0 %v34_v14 }
  0x20   :  { %180 = vmatpush.msra.mxu3 %v33_v15  ;;  %179 = vmatpush.msra.mxu2 %v33_v15 }
  0x21   :  { %92 = vmatmul.f32.vlgmr.msra.gmra.mxu3 %v26_v16  ;;  %77 = vmatmul.f32.vlgmr.msra.gmra.mxu2 %v21_v17 }
  0x22   :  { %64 = vmatpush.msra.mxu0 %v33_v15 }
  0x23   :  { %65 = vmatmul.f32.vlgmr.msra.gmra.mxu0 %v17_v22 }
  0x29   :  { %95 = vmatmul.f32.gmra.mxu3 %v27_v18  ;;  %80 = vmatmul.f32.gmra.mxu2 %v22_v19 }
  0x2b   :  { %68 = vmatmul.f32.gmra.mxu0 %v18_v25 }
  0x31   :  { %98 = vmatmul.f32.gmra.mxu3 %v28_v20  ;;  %83 = vmatmul.f32.gmra.mxu2 %v23_v21 }
  0x33   :  { %71 = vmatmul.f32.gmra.mxu0 %v19_v28 }
  0x39   :  { %101 = vmatmul.f32.gmra.mxu3 %v29_v23  ;;  %86 = vmatmul.f32.gmra.mxu2 %v24_v24 }
  0x3b   :  { %74 = vmatmul.f32.gmra.mxu0 %v20_v30 }
  0x41   :  { %104 = vmatmul.f32.gmra.mxu3 %v30_v26  ;;  %89 = vmatmul.f32.gmra.mxu2 %v25_v27 }
  0x49   :  { %107 = vmatmul.f32.gmra.mxu3 %v31_v29 }
  0x51   :  { %110 = vmatmul.f32.gmra.mxu3 %v32_v31 }
  0xa0   :  { %v66_v39 = vpop.f32.mrf.mxu0 }
  0xa4   :  { %v93_v32 = vpop.f32.mrf.mxu3  ;;  %v78_v35 = vpop.f32.mrf.mxu2 }
  0xa8   :  { %v69_v44 = vpop.f32.mrf.mxu0 }
  0xac   :  { %v96_v33 = vpop.f32.mrf.mxu3  ;;  %v81_v37 = vpop.f32.mrf.mxu2 }
  0xb0   :  { %v72_v46 = vpop.f32.mrf.mxu0 }
  0xb4   :  { %v99_v34 = vpop.f32.mrf.mxu3  ;;  %v84_v41 = vpop.f32.mrf.mxu2 }
  0xb8   :  { %v75_v47 = vpop.f32.mrf.mxu0 }
  0xbc   :  { %v102_v36 = vpop.f32.mrf.mxu3  ;;  %v87_v43 = vpop.f32.mrf.mxu2 }
  0xc4   :  { %v105_v38 = vpop.f32.mrf.mxu3  ;;  %v90_v45 = vpop.f32.mrf.mxu2 }
  0xcc   :  { %v108_v40 = vpop.f32.mrf.mxu3 }
  0xd4   :  { %v111_v42 = vpop.f32.mrf.mxu3 }
  0xd5   :  { %120 = vmatpush.msra.mxu1 %v111_v42 }
  0xd7   :  { %121 = vmatpush.msra.mxu1 %v108_v40 }
  0xd9   :  { %122 = vmatpush.msra.mxu1 %v105_v38 }
  0xdb   :  { %123 = vmatpush.msra.mxu1 %v102_v36 }
  0xdd   :  { %124 = vmatpush.msra.mxu1 %v99_v34 }
  0xdf   :  { %125 = vmatpush.msra.mxu1 %v96_v33 }
  0xe1   :  { %126 = vmatpush.msra.mxu1 %v93_v32 }
  0xe3   :  { %127 = vmatpush.msra.mxu1 %v90_v45 }
  0xe5   :  { %128 = vmatpush.msra.mxu1 %v87_v43 }
  0xe7   :  { %129 = vmatpush.msra.mxu1 %v84_v41 }
  0xe9   :  { %130 = vmatpush.msra.mxu1 %v81_v37 }
  0xeb   :  { %131 = vmatpush.msra.mxu1 %v78_v35 }
  0xed   :  { %132 = vmatpush.msra.mxu1 %v75_v47 }
  0xef   :  { %133 = vmatpush.msra.mxu1 %v72_v46 }
  0xf1   :  { %134 = vmatpush.msra.mxu1 %v69_v44 }
  0xf3   :  { %135 = vmatpush.msra.mxu1 %v66_v39 }
  0xf4   :  { %136 = vmatmul.f32.vlgmr.msra.gmra.mxu1 %v114_v48 }
  0xfc   :  { %139 = vmatmul.f32.gmra.mxu1 %v115_v49 }
 0x171   :  { %v137_v51 = vpop.f32.mrf.mxu1 }
 0x172   :  { %v138_v52 = vadd.f32 %v181_v50, %v137_v51 }
 0x174   :  { %143 = vst [vmem:[%s322_s4] sm:$0xff] %v138_v52 }
 0x179   :  { %v140_v53 = vpop.f32.mrf.mxu1 }
 0x17a   :  { %v141_v54 = vadd.f32 %v181_v50, %v140_v53 }
 0x17c   :  { %144 = vst [vmem:[%s322_s4 + $0x8] sm:$0xff] %v141_v54 }

</bundles_post_ra>
